<compile_context>
chip_gen: v7x
topology: tpu7x:2x2x1
jax: 0.10.0
libtpu: 0.0.40
codegen_flags: <defaults>
</compile_context>

<pallas_src>
import jax
import jax.numpy as jnp
from jax import lax
from jax.experimental import pallas as pl
from jax.experimental.pallas import tpu as pltpu


def _round_up(x, m):
    return ((x + m - 1) // m) * m


def _pick_tile(n, target, mult=1):
    """Largest divisor of n that is <= target, preferring multiples of `mult`."""
    cands = [t for t in range(1, min(n, target) + 1) if n % t == 0]
    pref = [t for t in cands if t % mult == 0]
    return (pref or cands)[-1]


# ----------------------------------------------------------------------------
# Pallas kernel: shared 1x1-conv MLP (BN folded) + ReLU, running max over K
# ----------------------------------------------------------------------------
def _make_msg_kernel(num_layers, tK, tS):
    def kernel(x_ref, *refs):
        out_ref = refs[2 * num_layers]
        acc_ref = refs[2 * num_layers + 1]
        k_blk = pl.program_id(2)

        @pl.when(k_blk == 0)
        def _init():
            acc_ref[...] = jnp.full_like(acc_ref, -jnp.inf)

        # One big matmul per layer: M = tK * tS rows (neighbor-major, query-minor),
        # contraction over the tiny channel dim (MXU pads it internally).
        h = x_ref[0, 0, 0]                               # (M, Din) bf16, contiguous block
        for l in range(num_layers):
            w = refs[2 * l][...]                         # (din_l, dout_l) bf16, BN folded
            sh = refs[2 * l + 1][...]                    # (1, dout_l) f32 shift
            a = jnp.dot(h, w, preferred_element_type=jnp.float32)   # MXU, f32 accumulate
            a = jnp.maximum(a + sh, 0.0)                 # folded-BN shift + ReLU (one bcast/layer)
            h = a.astype(jnp.bfloat16) if l + 1 < num_layers else a

        # Max over the tK neighbor slabs packed along M (pure VPU elementwise maxes).
        m = h[0:tS, :]
        for kk in range(1, tK):
            m = jnp.maximum(m, h[kk * tS:(kk + 1) * tS, :])

        acc_ref[...] = jnp.maximum(acc_ref[...], m)      # running max over K chunks

        @pl.when(k_blk == pl.num_programs(2) - 1)
        def _write():
            out_ref[0] = acc_ref[...]

    return kernel


def _vmem_limit_bytes(M, din, layer_params, tS, dout_pad):
    """Honest VMEM budget: blocks + weights + scratch + intermediates, with headroom."""
    lane = lambda d: _round_up(max(int(d), 1), 128)
    sub = lambda d: _round_up(max(int(d), 1), 16)
    in_blk = M * lane(din) * 2                                        # bf16, lane-padded in VMEM
    w_bytes = sum(sub(w.shape[0]) * lane(w.shape[1]) * 2 + 16 * lane(sh.shape[1]) * 4
                  for w, sh in layer_params)
    out_blk = _round_up(tS, 8) * dout_pad * 4
    acc = out_blk
    inter = M * max(lane(w.shape[1]) for w, _ in layer_params) * 4    # f32 activations
    structural = 2 * in_blk + 2 * w_bytes + 2 * out_blk + acc + 3 * inter
    # 2x headroom for Mosaic-internal temps; floor at the default scoped limit; stay
    # below v7x's 64 MiB physical per-TC VMEM.
    return int(min(max(2 * structural, 16 << 20), 60 << 20))


def msg_mlp_maxpool(grouped_blk, layer_params, dout_valid, tK, tS):
    """grouped_blk: (B, nK, nS, M, Din) bf16 with M = tK*tS (neighbor-major, query-minor).
    layer_params: list of (W (din_l, dout_l) bf16 with BN scale folded in,
                           shift (1, dout_l) f32); only the final dout is 128-padded.
    Returns (B, nS*tS, dout_valid) f32."""
    B, nK, nS, M, Din = grouped_blk.shape
    dout_pad = layer_params[-1][0].shape[1]
    S = nS * tS

    in_specs = [pl.BlockSpec((1, 1, 1, M, Din), lambda b, s, k: (b, k, s, 0, 0))]
    args = [grouped_blk]
    for (w, sh) in layer_params:
        in_specs.append(pl.BlockSpec(w.shape, lambda b, s, k: (0, 0)))
        in_specs.append(pl.BlockSpec(sh.shape, lambda b, s, k: (0, 0)))
        args.extend([w, sh])

    flops = 2 * B * S * nK * tK * sum(int(w.shape[0]) * int(w.shape[1])
                                      for w, _ in layer_params)
    bytes_accessed = int(grouped_blk.size) * 2 + B * S * dout_pad * 4 + \
        sum(int(w.size) * 2 + int(sh.size) * 4 for w, sh in layer_params)

    out = pl.pallas_call(
        _make_msg_kernel(len(layer_params), tK, tS),
        out_shape=jax.ShapeDtypeStruct((B, S, dout_pad), jnp.float32),
        grid=(B, nS, nK),                       # reduction (K) axis last
        in_specs=in_specs,
        out_specs=pl.BlockSpec((1, tS, dout_pad), lambda b, s, k: (b, s, 0)),
        scratch_shapes=[pltpu.VMEM((tS, dout_pad), jnp.float32)],
        compiler_params=pltpu.CompilerParams(
            dimension_semantics=("parallel", "parallel", "arbitrary"),
            vmem_limit_bytes=_vmem_limit_bytes(M, Din, layer_params, tS, dout_pad)),
        cost_estimate=pl.CostEstimate(flops=flops, transcendentals=0,
                                      bytes_accessed=bytes_accessed),
    )(*args)
    return out[..., :dout_valid]          # drop lane padding; stores themselves were lane-dense


# ----------------------------------------------------------------------------
# Plain-JAX glue: FPS, ball query (nearest-k within radius), knn gather
# ----------------------------------------------------------------------------
def farthest_point_sample(xyz, npoint):
    """xyz: (B, N, 3) -> (new_xyz (B, npoint, 3), idx (B, npoint)).
    Deterministic start at index 0 (PyTorch reference uses a random start)."""
    B, N, _ = xyz.shape

    def body(i, state):
        centroids, distance, farthest = state
        centroids = centroids.at[:, i].set(farthest)
        centroid = jnp.take_along_axis(xyz, farthest[:, None, None], axis=1)  # (B,1,3)
        dist = jnp.sum((xyz - centroid) ** 2, axis=-1)                        # (B,N)
        distance = jnp.minimum(distance, dist)
        farthest = jnp.argmax(distance, axis=-1).astype(jnp.int32)
        return centroids, distance, farthest

    centroids = jnp.zeros((B, npoint), jnp.int32)
    distance = jnp.full((B, N), 1e10, jnp.float32)
    farthest = jnp.zeros((B,), jnp.int32)
    centroids, _, _ = lax.fori_loop(0, npoint, body, (centroids, distance, farthest))
    new_xyz = jnp.take_along_axis(xyz, centroids[..., None], axis=1)
    return new_xyz, centroids


def knn_gather(feat, idx):
    """feat: (B, N, C), idx: (B, ...) int32 -> (B, ..., C)."""
    return jax.vmap(lambda f, i: f[i])(feat, idx)


def ball_query_nearest_idx(query_pcs, source_pcs, radius, k):
    """Nearest-k points within `radius`; out-of-radius slots fall back to the nearest
    point (use_nearest=True semantics).  Returns idx (B, S, K) int32."""
    # TODO(synk): O(B*S*N) dense distance + top_k — tile or fuse with the gather for large N.
    diff = query_pcs[:, :, None, :] - source_pcs[:, None, :, :]   # (B,S,N,3)
    sqrdists = jnp.sum(diff * diff, axis=-1)                      # (B,S,N)
    neg_d, idx = lax.top_k(-sqrdists, k)                          # k nearest, ascending dist
    dists = -neg_d
    valid = dists <= radius * radius
    idx = jnp.where(valid, idx, idx[..., :1])                     # replace OOR with nearest
    return idx.astype(jnp.int32)


# ----------------------------------------------------------------------------
# Module
# ----------------------------------------------------------------------------
class PointNetSetAbstractionMsgPallas:
    def __init__(self, npoint, radius_list, nsample_list, in_channel, mlp_list, key):
        self.npoint = npoint
        self.radius_list = radius_list
        self.nsample_list = nsample_list
        eps = 1e-5                                   # BatchNorm2d default eps
        self.din = in_channel + 3                    # unpadded channel count fed to the kernel
        self.params = []                             # per branch: [(W_folded bf16, shift f32), ...]
        self.dout_list = []                          # valid (unpadded) output channels per branch
        for mlp in mlp_list:
            layers = []
            last = self.din
            for li, out in enumerate(mlp):
                is_last = (li == len(mlp) - 1)
                # Only the FINAL layer is lane-padded (for unmasked output stores);
                # intermediate activations keep their natural width.
                out_pad = _round_up(out, 128) if is_last else out
                key, k1, k2, k3, k4, k5, k6 = jax.random.split(key, 7)
                w = 0.1 * jax.random.normal(k1, (out, last), jnp.float32)        # Conv2d(k=1) weight
                b = 0.1 * jax.random.normal(k2, (out,), jnp.float32)             # Conv2d bias
                gamma = 1.0 + 0.1 * jax.random.normal(k3, (out,), jnp.float32)
                beta = 0.1 * jax.random.normal(k4, (out,), jnp.float32)
                mean = 0.1 * jax.random.normal(k5, (out,), jnp.float32)          # BN running_mean
                var = jnp.abs(jax.random.normal(k6, (out,), jnp.float32)) + 0.5  # BN running_var
                # eval-mode BN folded:  y = scale*conv(x) + shift  ==  x @ (W^T*scale) + shift
                scale = gamma / jnp.sqrt(var + eps)
                shift = scale * (b - mean) + beta
                w_folded = jnp.transpose(w) * scale[None, :]                     # (last, out)
                w_pad = jnp.zeros((last, out_pad), jnp.float32).at[:, :out].set(w_folded)
                sh_pad = jnp.zeros((1, out_pad), jnp.float32).at[0, :out].set(shift)
                layers.append((w_pad.astype(jnp.bfloat16), sh_pad))
                last = out
            self.params.append(layers)
            self.dout_list.append(mlp[-1])

    def __call__(self, xyz, features=None):
        new_xyz, _ = farthest_point_sample(xyz, self.npoint)
        B, S, _ = new_xyz.shape
        outs = []
        for radius, nsample, layers, dout in zip(self.radius_list, self.nsample_list,
                                                 self.params, self.dout_list):
            K = nsample
            idx = ball_query_nearest_idx(new_xyz, xyz, radius, K)     # (B, S, K)

            # Tile selection: query tile a multiple of 8 (sublane-clean), neighbor chunk
            # sized so M = tK*tS ~ 2-4K rows feeds the 256-deep MXU on v6e/v7x.
            tS = _pick_tile(S, 256, mult=8)
            tK = _pick_tile(K, max(1, 4096 // max(tS, 1)))
            nS, nK = S // tS, K // tK

            # Gather directly in the kernel's blocked layout (no standalone transpose of
            # the big grouped tensor): permute the small index tensor instead.
            idx_b = (idx.transpose(0, 2, 1)                   # (B, K, S)
                        .reshape(B, nK, tK, nS, tS)
                        .transpose(0, 1, 3, 2, 4))            # (B, nK, nS, tK, tS)
            grouped_xyz = knn_gather(xyz, idx_b)              # (B, nK, nS, tK, tS, 3)
            centers = new_xyz.reshape(B, nS, tS, 3)[:, None, :, None]   # (B,1,nS,1,tS,3)
            grouped_xyz = grouped_xyz - centers
            if features is not None:
                grouped_feat = knn_gather(features, idx_b)    # (B, nK, nS, tK, tS, C)
                grouped = jnp.concatenate([grouped_xyz, grouped_feat], axis=-1)
            else:
                grouped = grouped_xyz
            # bf16 for the MXU; channels stay UNPADDED in HBM.  The trailing reshape just
            # merges the two contiguous (tK, tS) dims into the matmul M dim (free in XLA).
            grouped = grouped.astype(jnp.bfloat16).reshape(B, nK, nS, tK * tS, self.din)

            outs.append(msg_mlp_maxpool(grouped, layers, dout, tK, tS))   # (B, S, dout) f32
        # PyTorch concatenates along channels then permutes to (B, S, C_total);
        # channels-last here, so concat along the last axis directly.
        new_features = jnp.concatenate(outs, axis=-1)
        return new_xyz, new_features


if __name__ == "__main__":
    key = jax.random.PRNGKey(0)
    kx, kf, kp = jax.random.split(key, 3)
    B, N, C = 2, 32, 4
    xyz = jax.random.normal(kx, (B, N, 3), jnp.float32)
    features = jax.random.normal(kf, (B, N, C), jnp.float32)

    module = PointNetSetAbstractionMsgPallas(
        npoint=8,
        radius_list=[0.5, 1.0],
        nsample_list=[8, 16],
        in_channel=C,
        mlp_list=[[16, 32], [16, 32, 64]],
        key=kp,
    )

    new_xyz, new_features = module(xyz, features)
    jax.block_until_ready((new_xyz, new_features))

    assert new_xyz.shape == (B, 8, 3), new_xyz.shape
    assert new_features.shape == (B, 8, 32 + 64), new_features.shape
    assert new_xyz.dtype == jnp.float32 and new_features.dtype == jnp.float32
    assert bool(jnp.all(jnp.isfinite(new_features)))
    print("KERNEL_OK")
</pallas_src>

<mosaic_0001>
module attributes {stable_mosaic.version = 11 : i64} {
  func.func @kernel(%arg0: i32, %arg1: i32, %arg2: i32, %arg3: memref<1x1x1x64x7xbf16, #tpu.memory_space<vmem>>, %arg4: memref<7x16xbf16, #tpu.memory_space<vmem>>, %arg5: memref<1x16xf32, #tpu.memory_space<vmem>>, %arg6: memref<16x128xbf16, #tpu.memory_space<vmem>>, %arg7: memref<1x128xf32, #tpu.memory_space<vmem>>, %arg8: memref<1x8x128xf32, #tpu.memory_space<vmem>>, %arg9: memref<8x128xf32, #tpu.memory_space<vmem>>) attributes {dimension_semantics = [#tpu.dimension_semantics<parallel>, #tpu.dimension_semantics<parallel>, #tpu.dimension_semantics<arbitrary>], iteration_bounds = array<i64: 2, 1, 1>, scalar_prefetch = 0 : i64, scratch_operands = 1 : i64, tpu.core_type = #tpu.core_type<tc>, window_params = [{transform_indices = @transform_0, window_bounds = array<i64: 1, 1, 1, 64, 7>}, {pipeline_mode = #tpu.pipeline_mode<synchronous>, transform_indices = @transform_1, window_bounds = array<i64: 7, 16>}, {pipeline_mode = #tpu.pipeline_mode<synchronous>, transform_indices = @transform_2, window_bounds = array<i64: 1, 16>}, {pipeline_mode = #tpu.pipeline_mode<synchronous>, transform_indices = @transform_3, window_bounds = array<i64: 16, 128>}, {pipeline_mode = #tpu.pipeline_mode<synchronous>, transform_indices = @transform_4, window_bounds = array<i64: 1, 128>}, {transform_indices = @transform_5, window_bounds = array<i64: 1, 8, 128>}]} {
    %c0_i32 = arith.constant 0 : i32
    %0 = arith.cmpi eq, %arg2, %c0_i32 : i32
    %1 = arith.extui %0 : i1 to i32
    %c0_i32_0 = arith.constant 0 : i32
    %2 = arith.cmpi ne, %1, %c0_i32_0 : i32
    scf.if %2 {
      %cst_22 = arith.constant 0xFF800000 : f32
      %41 = vector.broadcast %cst_22 : f32 to vector<8x128xf32>
      %c0_23 = arith.constant 0 : index
      %c0_24 = arith.constant 0 : index
      %42 = vector.load %arg9[%c0_23, %c0_24] : memref<8x128xf32, #tpu.memory_space<vmem>>, vector<8x128xf32>
      tpu.vector_store %arg9[%c0_23, %c0_24], %41 {strides = array<i32>} : memref<8x128xf32, #tpu.memory_space<vmem>>, vector<8x128xf32>,
    } else {
    }
    %c0 = arith.constant 0 : index
    %c0_1 = arith.constant 0 : index
    %c0_2 = arith.constant 0 : index
    %c0_3 = arith.constant 0 : index
    %c0_4 = arith.constant 0 : index
    %3 = vector.load %arg3[%c0, %c0_1, %c0_2, %c0_3, %c0_4] : memref<1x1x1x64x7xbf16, #tpu.memory_space<vmem>>, vector<1x1x1x64x7xbf16>
    %4 = vector.shape_cast %3 : vector<1x1x1x64x7xbf16> to vector<64x7xbf16>
    %c0_5 = arith.constant 0 : index
    %c0_6 = arith.constant 0 : index
    %5 = vector.load %arg4[%c0_5, %c0_6] : memref<7x16xbf16, #tpu.memory_space<vmem>>, vector<7x16xbf16>
    %c0_7 = arith.constant 0 : index
    %c0_8 = arith.constant 0 : index
    %6 = vector.load %arg5[%c0_7, %c0_8] : memref<1x16xf32, #tpu.memory_space<vmem>>, vector<1x16xf32>
    %cst = arith.constant dense<0.000000e+00> : vector<64x16xf32>
    %7 = tpu.matmul %4, %5, %cst {dimension_numbers = #tpu.dot_dimension_numbers<[1], [0], [0], [1], [0, 0, 1, 1], [], []>} : vector<64x7xbf16>, vector<7x16xbf16>, vector<64x16xf32> -> vector<64x16xf32>
    %8 = vector.broadcast %6 : vector<1x16xf32> to vector<64x16xf32>
    %9 = arith.addf %7, %8 : vector<64x16xf32>
    %cst_9 = arith.constant 0.000000e+00 : f32
    %10 = vector.broadcast %cst_9 : f32 to vector<64x16xf32>
    %11 = arith.maximumf %9, %10 : vector<64x16xf32>
    %12 = arith.truncf %11 : vector<64x16xf32> to vector<64x16xbf16>
    %c0_10 = arith.constant 0 : index
    %c0_11 = arith.constant 0 : index
    %13 = vector.load %arg6[%c0_10, %c0_11] : memref<16x128xbf16, #tpu.memory_space<vmem>>, vector<16x128xbf16>
    %c0_12 = arith.constant 0 : index
    %c0_13 = arith.constant 0 : index
    %14 = vector.load %arg7[%c0_12, %c0_13] : memref<1x128xf32, #tpu.memory_space<vmem>>, vector<1x128xf32>
    %cst_14 = arith.constant dense<0.000000e+00> : vector<64x128xf32>
    %15 = tpu.matmul %12, %13, %cst_14 {dimension_numbers = #tpu.dot_dimension_numbers<[1], [0], [0], [1], [0, 0, 1, 1], [], []>} : vector<64x16xbf16>, vector<16x128xbf16>, vector<64x128xf32> -> vector<64x128xf32>
    %16 = vector.broadcast %14 : vector<1x128xf32> to vector<64x128xf32>
    %17 = arith.addf %15, %16 : vector<64x128xf32>
    %cst_15 = arith.constant 0.000000e+00 : f32
    %18 = vector.broadcast %cst_15 : f32 to vector<64x128xf32>
    %19 = arith.maximumf %17, %18 : vector<64x128xf32>
    %20 = vector.extract_strided_slice %19 {offsets = [0, 0], sizes = [8, 128], strides = [1, 1]} : vector<64x128xf32> to vector<8x128xf32>
    %21 = vector.extract_strided_slice %19 {offsets = [8, 0], sizes = [8, 128], strides = [1, 1]} : vector<64x128xf32> to vector<8x128xf32>
    %22 = arith.maximumf %20, %21 : vector<8x128xf32>
    %23 = vector.extract_strided_slice %19 {offsets = [16, 0], sizes = [8, 128], strides = [1, 1]} : vector<64x128xf32> to vector<8x128xf32>
    %24 = arith.maximumf %22, %23 : vector<8x128xf32>
    %25 = vector.extract_strided_slice %19 {offsets = [24, 0], sizes = [8, 128], strides = [1, 1]} : vector<64x128xf32> to vector<8x128xf32>
    %26 = arith.maximumf %24, %25 : vector<8x128xf32>
    %27 = vector.extract_strided_slice %19 {offsets = [32, 0], sizes = [8, 128], strides = [1, 1]} : vector<64x128xf32> to vector<8x128xf32>
    %28 = arith.maximumf %26, %27 : vector<8x128xf32>
    %29 = vector.extract_strided_slice %19 {offsets = [40, 0], sizes = [8, 128], strides = [1, 1]} : vector<64x128xf32> to vector<8x128xf32>
    %30 = arith.maximumf %28, %29 : vector<8x128xf32>
    %31 = vector.extract_strided_slice %19 {offsets = [48, 0], sizes = [8, 128], strides = [1, 1]} : vector<64x128xf32> to vector<8x128xf32>
    %32 = arith.maximumf %30, %31 : vector<8x128xf32>
    %33 = vector.extract_strided_slice %19 {offsets = [56, 0], sizes = [8, 128], strides = [1, 1]} : vector<64x128xf32> to vector<8x128xf32>
    %34 = arith.maximumf %32, %33 : vector<8x128xf32>
    %c0_16 = arith.constant 0 : index
    %c0_17 = arith.constant 0 : index
    %35 = vector.load %arg9[%c0_16, %c0_17] : memref<8x128xf32, #tpu.memory_space<vmem>>, vector<8x128xf32>
    %36 = arith.maximumf %35, %34 : vector<8x128xf32>
    %c0_18 = arith.constant 0 : index
    %c0_19 = arith.constant 0 : index
    %37 = vector.load %arg9[%c0_18, %c0_19] : memref<8x128xf32, #tpu.memory_space<vmem>>, vector<8x128xf32>
    tpu.vector_store %arg9[%c0_18, %c0_19], %36 {strides = array<i32>} : memref<8x128xf32, #tpu.memory_space<vmem>>, vector<8x128xf32>,
    %c0_i32_20 = arith.constant 0 : i32
    %38 = arith.cmpi eq, %arg2, %c0_i32_20 : i32
    %39 = arith.extui %38 : i1 to i32
    %c0_i32_21 = arith.constant 0 : i32
    %40 = arith.cmpi ne, %39, %c0_i32_21 : i32
    scf.if %40 {
      %c0_22 = arith.constant 0 : index
      %c0_23 = arith.constant 0 : index
      %41 = vector.load %arg9[%c0_22, %c0_23] : memref<8x128xf32, #tpu.memory_space<vmem>>, vector<8x128xf32>
      %c0_24 = arith.constant 0 : index
      %c0_25 = arith.constant 0 : index
      %c0_26 = arith.constant 0 : index
      %42 = vector.load %arg8[%c0_24, %c0_25, %c0_26] : memref<1x8x128xf32, #tpu.memory_space<vmem>>, vector<1x8x128xf32>
      %43 = vector.shape_cast %42 : vector<1x8x128xf32> to vector<8x128xf32>
      %44 = vector.shape_cast %41 : vector<8x128xf32> to vector<1x8x128xf32>
      tpu.vector_store %arg8[%c0_24, %c0_25, %c0_26], %44 {strides = array<i32>} : memref<1x8x128xf32, #tpu.memory_space<vmem>>, vector<1x8x128xf32>,
    } else {
    }
    return
  }
  func.func @transform_0(%arg0: i32, %arg1: i32, %arg2: i32) -> (i32, i32, i32, i32, i32) {
    %c0_i32 = arith.constant 0 : i32
    %c0_i32_0 = arith.constant 0 : i32
    %c0_i32_1 = arith.constant 0 : i32
    return %arg0, %arg2, %arg1, %c0_i32, %c0_i32_0 : i32, i32, i32, i32, i32
  }
  func.func @transform_1(%arg0: i32, %arg1: i32, %arg2: i32) -> (i32, i32) {
    %c0_i32 = arith.constant 0 : i32
    %c0_i32_0 = arith.constant 0 : i32
    %c0_i32_1 = arith.constant 0 : i32
    return %c0_i32, %c0_i32_0 : i32, i32
  }
  func.func @transform_2(%arg0: i32, %arg1: i32, %arg2: i32) -> (i32, i32) {
    %c0_i32 = arith.constant 0 : i32
    %c0_i32_0 = arith.constant 0 : i32
    %c0_i32_1 = arith.constant 0 : i32
    return %c0_i32, %c0_i32_0 : i32, i32
  }
  func.func @transform_3(%arg0: i32, %arg1: i32, %arg2: i32) -> (i32, i32) {
    %c0_i32 = arith.constant 0 : i32
    %c0_i32_0 = arith.constant 0 : i32
    %c0_i32_1 = arith.constant 0 : i32
    return %c0_i32, %c0_i32_0 : i32, i32
  }
  func.func @transform_4(%arg0: i32, %arg1: i32, %arg2: i32) -> (i32, i32) {
    %c0_i32 = arith.constant 0 : i32
    %c0_i32_0 = arith.constant 0 : i32
    %c0_i32_1 = arith.constant 0 : i32
    return %c0_i32, %c0_i32_0 : i32, i32
  }
  func.func @transform_5(%arg0: i32, %arg1: i32, %arg2: i32) -> (i32, i32, i32) {
    %c0_i32 = arith.constant 0 : i32
    %c0_i32_0 = arith.constant 0 : i32
    return %arg0, %arg1, %c0_i32 : i32, i32, i32
  }
}

</mosaic_0001>

<bundles_post_ra>
// kernel: tpu_custom_call.1
= control target key start
LH: loop header
LB: loop body
LE: loop exit
PB: predicated region body
PF: predicated region fallthrough
CT: control target
= control target key end

     0   :  { %10 = vsyncpa [#allocation4], 0  ;;  %s987_s0 = inlined_call_operand.vmem [shape: bf16[2,1,1,64,7], index: 0, kind: input, shape index: {}]   ;;  %s988_s1 = inlined_call_operand.vmem [shape: bf16[7,16], index: 1, kind: input, shape index: {}]   ;;  %s989_s2 = inlined_call_operand.vmem [shape: f32[1,16], index: 2, kind: input, shape index: {}]   ;;  %s990_s3 = inlined_call_operand.vmem [shape: bf16[16,128], index: 3, kind: input, shape index: {}]   ;;  %s991_s4 = inlined_call_operand.vmem [shape: f32[1,128], index: 4, kind: input, shape index: {}]   ;;  %s992_s5 = inlined_call_operand.hbm [shape: f32[2,8,128], index: 5, kind: output, shape index: {}]  }
   0x1   :  { %12 = vsyncpa [#allocation4 + $0x1], 0  ;;  %s859_s18 = smov 0   ;;  %s861_s19 = smov 0  }
   0x2   :  { %s863_s20 = smov 0   ;;  %s865_s21 = smov 0  }
   0x3   :  { %s867_s22 = smov 0   ;;  %s869_s23 = smov 0  }
   0x4 LB: > { %s628_s24 = sadd.s32 4294967295, %s825_s23   ;;  %s629_s25 = sadd.s32 4294967294, %s825_s23   ;;  %s825_s23 = sphi %s869_s23, %s18_s23   ;;  %s821_s22 = sphi %s867_s22, %s999_s22   ;;  %s817_s21 = sphi %s865_s21, %s998_s21   ;;  %s813_s20 = sphi %s863_s20, %s997_s20   ;;  %s809_s19 = sphi %s861_s19, %s996_s19   ;;  %s805_s18 = sphi %s859_s18, %s995_s18  }
   0x5   : > { %s37_s26 = sadd.s32 1, %s821_s22  ;;  %s160_s27 = sadd.s32 1, %s813_s20 }
   0x6   : > { %p39_p0 = scmp.ge.s32.totalorder %s37_s26, 2  ;;  %p170_p1 = scmp.ne.s32.totalorder %s813_s20, %s809_s19 }
   0x7   : > { %p171_p2 = scmp.eq.s32.totalorder %s628_s24, 1  ;;  %p176_p3 = scmp.ne.s32.totalorder %s809_s19, %s805_s18 }
   0x8   : > { %s1001_s26 = smov (%p39_p0, %s37_s26), 0  ;;  %p177_p5 = scmp.eq.s32.totalorder %s629_s25, 1 }
   0x9   : > { %p899_p4 = por %p171_p2, %p170_p1  ;;  %s155_s29 = ssub.s32 %s821_s22, %s1001_s26 }
   0xa   : > { %p632_p6 = scmp.ge.s32.totalorder %s825_s23, 1  ;;  %p158_p7 = scmp.eq.s32.totalorder %s155_s29, 0 }
   0xb   : > { %p906_p8 = por %p177_p5, %p176_p3  ;;  %p223_p9 = scmp.lt.s32.totalorder %s825_s23, 3 }
   0xc   : > { %s912_s6 = scalar_select %p158_p7, %s813_s20, %s160_s27  }
   0xd   : > { %p224_p10 = pnand %p632_p6, %p223_p9 }
   0xe   : > { %v286_v0 = vld [vmem:[%s988_s1] sm:$0xf] (!%p224_p10)  ;;  %vm327_vm0 = vcmask (!%p224_p10), 1042432   ;;  %vm328_vm1 = vcmask (!%p224_p10), 1043456   ;;  %p259_p11 = scmp.lt.s32.totalorder (!%p224_p10), %s817_s21, 1  ;;  %v827_v1 = vmov (!%p224_p10), 65535  }
   0xf   : > { %227 = sbr.rel (%p224_p10) target bundleno = 497 (0x1f1), region = 40  ;;  %v329_v2 = vsel (!%p224_p10), %vm327_vm0, 4294967295, %v827_v1  ;;  %vm314_vm2 = vcmask (!%p224_p10), 56320   ;;  %v746_v9 = vld [vmem:[%s990_s3] sm:$0xff] (!%p224_p10)   ;;  %vm426_vm3 = vcmask (!%p224_p10), 130048   ;;  %s256_s27 = sand.u32 (!%p224_p10), 1, %s809_s19  }
  0x10   : > { %v330_v3 = vsel (!%p224_p10), %vm328_vm1, %v329_v2, 0  ;;  %676 = vmatprep.subr.bf16.mxu1 (!%p224_p10), %v746_v9  ;;  %v636_v10 = vld [vmem:[%s989_s2] ss:$0 sm:$0xff] (!%p224_p10)  ;;  %s633_s29 = sshll.u32 (!%p224_p10), %s256_s27, 3  ;;  %s652_s7 = sshll.u32 (!%p224_p10), %s817_s21, 7 }
  0x11   : > { %v332_v4 = vand.u32 (!%p224_p10), %v330_v3, %v286_v0  ;;  %677 = vmatpush3.bf16.msra.mxu1 (!%p224_p10), %v746_v9  ;;  %v645_v39 = vld [vmem:[%s991_s4] ss:$0 sm:$0xff] (!%p224_p10)  ;;  %s258_s8 = scalar_lea.vmem (!%p224_p10), [#allocation3], %s633_s29  ;;  %s940_s12 = scalar_lea.hbm (!%p224_p10), %s992_s5, %s652_s7 }
  0x13   : > { %666 = vmatprep.subr.bf16.mxu0 (!%p224_p10), %v332_v4 }
  0x14   : > { %667 = vmatpush3.bf16.msra.mxu0 (!%p224_p10), %v332_v4 }
  0x16   : > { %s260_s9 = scalar_select %p259_p11, %s817_s21, 1 }
  0x17   : > { %s828_s21 = smov [#allocation3]  }
  0x18   : > { %s655_s10 = sshll.u32 %s260_s9, 5  ;;  %s542_s9 = sshll.u32 %s258_s8, 4  ;;  %s942_s9 = int_to_ptr.vmem [resolvable:$true] %s542_s9 }
  0x19   : > { %s271_s13 = scalar_lea.vmem %s987_s0, %s655_s10  ;;  %s747_s14 = scalar_lea.vmem %s942_s9, 128 }
  0x1a   : > { %v742_v5 = vld [vmem:[%s271_s13] sm:$0xff]   ;;  %v743_v6 = vld [vmem:[%s271_s13 + $0x8] sm:$0xff]   ;;  %v744_v7 = vld [vmem:[%s271_s13 + $0x10] sm:$0xff]   ;;  %p748_p12 = scmp.ne.s32.totalorder %s942_s9, %s747_s14  ;;  %s751_s15 = sshll.u32 %s828_s21, 4  ;;  %s752_s15 = int_to_ptr.vmem [resolvable:$false] %s751_s15 }
  0x1b   : > { %668 = vmatprep.mubr.msk.bf16.mxu0 %vm314_vm2, %v742_v5  ;;  %v745_v8 = vld [vmem:[%s271_s13 + $0x18] sm:$0xff]   ;;  %s528_s13 = scalar_lea.sflag [#allocation4], %s256_s27  ;;  %s753_s16 = scalar_lea.vmem %s752_s15, 256 }
  0x1c   : > { %669 = vmatmul.mubr.msk.bf16.vlgmr.msra.gmra.mrb[0].mxu0 %vm314_vm2, %v743_v6  ;;  %p749_p13 = pnand %p748_p12, %p899_p4  ;;  %p754_p1 = scmp.lt.s32.totalorder %s942_s9, %s752_s15 }
  0x1d   : > { %672 = vmatprep.mubr.msk.bf16.mxu0 %vm314_vm2, %v744_v7  ;;  %p755_p2 = scmp.lt.s32.totalorder %s753_s16, %s747_s14 }
  0x1e   : > { %p750_p0 = pneg %p749_p13 }
  0x1f   : > { %p756_p3 = por %p755_p2, %p754_p1 }
  0x21   : > { %p757_p5 = pnand %p756_p3, %p750_p0 }
  0x24   : > { %673 = vmatmul.mubr.msk.bf16.gmra.mrb[4].mxu0 %vm314_vm2, %v745_v8 }
  0xef   : > { %v670_v11 = vpop.f32.mrb[0].mxu0 }
  0xf0   : > { %v377_v12 = vadd.f32 %v670_v11, %v636_v10  ;;  %v368_v13 = vpop.f32.mrb[1].mxu0 }
  0xf1   : > { %v369_v14 = vadd.f32 %v636_v10, %v368_v13  ;;  %v671_v15 = vpop.f32.mrb[2].mxu0 }
  0xf2   : > { %v380_v16 = vadd.f32 %v671_v15, %v636_v10  ;;  %v371_v17 = vpop.f32.mrb[3].mxu0  ;;  %v401_v19 = vmax.f32 %v377_v12, 0.0 }
  0xf3   : > { %v372_v18 = vadd.f32 %v636_v10, %v371_v17  ;;  %v399_v21 = vmax.f32 %v369_v14, 0.0 }
  0xf4   : > { %v402_v20 = vmax.f32 %v380_v16, 0.0 }
  0xf5   : > { %v400_v22 = vmax.f32 %v372_v18, 0.0 }
  0xf6   : > { %v408_v23 = vpack.c.bf16 %v402_v20, %v401_v19 }
  0xf7   : > { %v674_v24 = vpop.f32.mrb[4].mxu0  ;;  %v407_v25 = vpack.c.bf16 %v400_v22, %v399_v21 }
  0xf8   : > { %v393_v26 = vadd.f32 %v674_v24, %v636_v10  ;;  %v384_v27 = vpop.f32.mrb[5].mxu0 }
  0xf9   : > { %v385_v28 = vadd.f32 %v636_v10, %v384_v27  ;;  %v675_v29 = vpop.f32.mrb[6].mxu0  ;;  %678 = vmatprep.mubr.msk.bf16.mxu1 %vm426_vm3, %v407_v25 }
  0xfa   : > { %v396_v30 = vadd.f32 %v675_v29, %v636_v10  ;;  %v387_v31 = vpop.f32.mrb[7].mxu0  ;;  %679 = vmatmul.mubr.msk.bf16.vlgmr.msra.gmra.mrb[0].mxu1 %vm426_vm3, %v408_v23  ;;  %v405_v33 = vmax.f32 %v393_v26, 0.0 }
  0xfb   : > { %v388_v32 = vadd.f32 %v636_v10, %v387_v31  ;;  %v403_v35 = vmax.f32 %v385_v28, 0.0 }
  0xfc   : > { %v406_v34 = vmax.f32 %v396_v30, 0.0 }
  0xfd   : > { %v404_v36 = vmax.f32 %v388_v32, 0.0 }
  0xfe   : > { %v410_v37 = vpack.c.bf16 %v406_v34, %v405_v33 }
  0xff   : > { %v409_v38 = vpack.c.bf16 %v404_v36, %v403_v35 }
 0x101   : > { %682 = vmatprep.mubr.msk.bf16.mxu1 %vm426_vm3, %v409_v38 }
 0x102   : > { %683 = vmatmul.mubr.msk.bf16.gmra.mrb[4].mxu1 %vm426_vm3, %v410_v37 }
 0x1cd   : > { %v680_v40 = vpop.f32.mrb[0].mxu1 }
 0x1ce   : > { %v473_v41 = vpop.f32.mrb[1].mxu1  ;;  %v482_v45 = vadd.f32 %v680_v40, %v645_v39 }
 0x1cf   : > { %v474_v42 = vadd.f32 %v645_v39, %v473_v41  ;;  %v681_v43 = vpop.f32.mrb[2].mxu1 }
 0x1d0   : > { %v476_v44 = vpop.f32.mrb[3].mxu1  ;;  %v485_v48 = vadd.f32 %v681_v43, %v645_v39  ;;  %v506_v50 = vmax.f32 %v482_v45, 0.0 }
 0x1d1   : > { %v477_v46 = vadd.f32 %v645_v39, %v476_v44  ;;  %v504_v47 = vmax.f32 %v474_v42, 0.0 }
 0x1d2   : > { %v507_v54 = vmax.f32 %v485_v48, 0.0 }
 0x1d3   : > { %v505_v49 = vmax.f32 %v477_v46, 0.0 }
 0x1d5   : > { %v512_v51 = vmax.f32 %v504_v47, %v505_v49  ;;  %v684_v52 = vpop.f32.mrb[4].mxu1 }
 0x1d6   : > { %v489_v53 = vpop.f32.mrb[5].mxu1  ;;  %v498_v59 = vadd.f32 %v684_v52, %v645_v39 }
 0x1d7   : > { %v513_v55 = vmax.f32 %v512_v51, %v506_v50  ;;  %v490_v56 = vadd.f32 %v645_v39, %v489_v53  ;;  %v685_v57 = vpop.f32.mrb[6].mxu1 }
 0x1d8   : > { %v492_v58 = vpop.f32.mrb[7].mxu1  ;;  %v501_v0 = vadd.f32 %v685_v57, %v645_v39  ;;  %v510_v2 = vmax.f32 %v498_v59, 0.0 }
 0x1d9   : > { %v508_v60 = vmax.f32 %v490_v56, 0.0  ;;  %v514_v61 = vmax.f32 %v513_v55, %v507_v54  ;;  %v493_v62 = vadd.f32 %v645_v39, %v492_v58 }
 0x1da   : > { %v511_v4 = vmax.f32 %v501_v0, 0.0 }
 0x1db   : > { %v515_v63 = vmax.f32 %v514_v61, %v508_v60  ;;  %v509_v1 = vmax.f32 %v493_v62, 0.0 }
 0x1dd   : > { %v516_v3 = vmax.f32 %v515_v63, %v509_v1 }
 0x1df   : > { %v517_v5 = vmax.f32 %v516_v3, %v510_v2 }
 0x1e1   : > { %v518_v6 = vmax.f32 %v517_v5, %v511_v4 }
 0x1e3   : > { %526 = vst [vmem:[%s258_s8] sm:$0xff] %v518_v6 }
 0x1e4   : > { %760 = shalt.err (!%p757_p5)
}
 0x1e5   : > { %s761_s17 = scalar_lea.hbm %s940_s12, 128  ;;  %s765_s27 = scalar_lea.hbm %s992_s5, 256 }
 0x1e6   : > { %p762_p6 = scmp.ne.s32.totalorder %s940_s12, %s761_s17  ;;  %p766_p10 = scmp.lt.u32.totalorder %s940_s12, %s992_s5 }
 0x1e7   : > { %p767_p11 = scmp.lt.u32.totalorder %s765_s27, %s761_s17  ;;  %p769_p13 = scmp.lt.u32.totalorder %s761_s17, %s940_s12 }
 0x1e8   : > { %p763_p7 = pnand %p762_p6, %p899_p4 }
 0x1e9   : > { %p768_p12 = por %p767_p11, %p766_p10 }
 0x1ea   : > { %p764_p9 = pneg %p763_p7 }
 0x1eb   : > { %p770_p0 = por %p769_p13, %p768_p12 }
 0x1ed   : > { %p771_p1 = pnand %p770_p0, %p764_p9 }
 0x1ef   : > { %774 = shalt.err (!%p771_p1)
}
 0x1f0   : > { %686 = dma.vmem_to_hbm [thread:$0]  (%p899_p4), %s942_s9, 128, %s940_s12, %s528_s13  }
 0x1f1 PF: > { %p692_p2 = scmp.ge.s32.totalorder %s825_s23, 2  ;;  %s554_s8 = sand.u32 1, %s805_s18  }
 0x1f2   : > { %s555_s10 = scalar_lea.sflag [#allocation4], %s554_s8 }
 0x1f3   : > { %p689_p3 = pnand %p692_p2, %p906_p8 }
 0x1f5   : > { %800 = dma.done.wait (!%p689_p3), %s555_s10, 128  }
 0x1f6   : > { %802 = vsyncadd (!%p689_p3), %s555_s10, 4294967168  ;;  %s18_s23 = sadd.s32 1, %s825_s23   ;;  %s995_s18 = smov %s809_s19 }
 0x1f7   : > { %p15_p5 = scmp.ge.s32.totalorder %s18_s23, 4   ;;  %s996_s19 = smov %s813_s20 }
 0x1f8   : > { %s997_s20 = smov %s912_s6  ;;  %s998_s21 = smov %s821_s22 }
 0x1f9   : > { %s999_s22 = smov %s1001_s26  ;;  %17 = sbr.rel (!%p15_p5) target bundleno = 4 (0x4), region = 83 }
 0x200   :  { %560 = vsyncpa [#allocation4], 1 }
 0x201   :  { %562 = vsyncpa [#allocation4 + $0x1], 1 }

</bundles_post_ra>
